<compile_context>
chip_gen: v7x
topology: tpu7x:2x2x1
jax: 0.10.0
libtpu: 0.0.40
codegen_flags: <defaults>
</compile_context>

<pallas_src>
import functools
import math

import jax
import jax.numpy as jnp
from jax.experimental import pallas as pl
from jax.experimental.pallas import tpu as pltpu

LANES = 128
NUM_CORES = 2            # megacore split for v7x; harmless sequential loop on v5e/v6e
SENTINEL_LOGIT = -100.0  # with target 0 this yields exactly zero focal loss


def _focal_loss_kernel(x_ref, t_ref, o_ref, acc_ref, *,
                       alpha, gamma, tile_rows, steps, valid_rows,
                       first_masked_block, num_grid_blocks):
    # x_ref, t_ref : (tile_rows, 128) tiles of the flattened logits / targets
    # o_ref        : (8, 128) per-core partial-sum output block (VMEM, lane dense)
    # acc_ref      : (8, 128) f32 accumulator (VMEM scratch, resident across the
    #                reduction axis; per-core under megacore)
    c = pl.program_id(0)          # core (parallel) axis
    j = pl.program_id(1)          # reduction (arbitrary) axis

    @pl.when(j == 0)
    def _init():
        acc_ref[...] = jnp.zeros_like(acc_ref)

    x = x_ref[...].astype(jnp.float32)
    t = t_ref[...].astype(jnp.float32)

    is_pos = t > 0.5

    # Stable binary_cross_entropy_with_logits:
    #   BCE = max(x, 0) - x*t + log1p(exp(-|x|))
    z = jnp.exp(-jnp.abs(x))                                   # EUP
    bce = jnp.maximum(x, 0.0) - x * t + jnp.log1p(z)           # EUP (log1p)

    # pt = exp(-BCE) for binary targets, without a third exp:
    #   pt = [1 if (t>0.5) == (x>=0) else z] / (1 + z)
    # TODO(synk): this identity assumes binary targets (matching the module's intent);
    # soft targets in (0,1) would need pt = exp(-bce).
    numer = jnp.where(jnp.logical_xor(is_pos, x < 0.0), 1.0, z)
    pt = numer * pl.reciprocal(1.0 + z, approx=False)

    one_minus_pt = 1.0 - pt
    if float(gamma) == 2.0:
        mod = one_minus_pt * one_minus_pt                       # no pow for gamma=2
    else:
        mod = jnp.power(one_minus_pt, jnp.float32(gamma))

    # alpha * pos + (1-alpha) * neg, preserving t == 0.5 -> weight 0
    w = jnp.where(is_pos, jnp.float32(alpha),
                  jnp.where(t < 0.5, jnp.float32(1.0 - alpha), jnp.float32(0.0)))
    f_loss = w * (mod * bce)

    # Global block index. Phantom blocks on the tail core (index >= number of real
    # blocks) and the partial last real block are the only ones that need masking.
    blk = c * steps + j

    def _accumulate(vals):
        # Pure cross-vreg VALU adds into the (8,128) accumulator; the sublane+lane
        # reduce is deferred to the wrapper.
        acc_ref[...] += jnp.sum(vals.reshape(tile_rows // 8, 8, LANES), axis=0)

    if first_masked_block < num_grid_blocks:
        @pl.when(blk < first_masked_block)
        def _hot():
            _accumulate(f_loss)

        @pl.when(blk >= first_masked_block)
        def _tail():
            row = (jax.lax.broadcasted_iota(jnp.int32, f_loss.shape, 0)
                   + blk * tile_rows)
            # jnp.where (not a 0/1 multiply) so garbage/NaN padded rows cannot leak.
            _accumulate(jnp.where(row < valid_rows, f_loss, 0.0))
    else:
        _accumulate(f_loss)

    @pl.when(j == steps - 1)
    def _finalize():
        o_ref[...] = acc_ref[...]


def official_binary_focal_loss(inputs, targets, alpha=0.25, gamma=2.0, *,
                               max_tile_rows=None):
    """inputs/targets: same shape (any rank). Returns scalar f32 focal loss (mean)."""
    assert inputs.shape == targets.shape
    n = math.prod(inputs.shape)
    assert n > 0
    rows = pl.cdiv(n, LANES)
    n_row_pad = rows * LANES

    def _prep(a, fill):
        flat = a.reshape(-1)
        if n_row_pad != n:
            # Only the <128-element tail is padded; the sentinel contributes exactly
            # zero loss so no per-element validity mask is needed in the kernel.
            flat = jnp.pad(flat, (0, n_row_pad - n), constant_values=fill)
        return flat.reshape(rows, LANES)

    x2 = _prep(inputs, SENTINEL_LOGIT)
    t2 = _prep(targets, 0.0)

    bytes_per_elem = x2.dtype.itemsize + t2.dtype.itemsize
    if max_tile_rows is None:
        # ~2 MiB per input tile per buffer -> 2 inputs x 2 buffers ~= 8 MiB VMEM
        # (4096 rows for f32 inputs, 8192 for bf16) -- fits v5e's 16 MiB scoped default.
        max_tile_rows = (4 * 1024 * 1024) // (LANES * bytes_per_elem)
        max_tile_rows = max(8, (max_tile_rows // 8) * 8)
    assert max_tile_rows % 8 == 0

    rows8 = ((rows + 7) // 8) * 8
    tile_rows = min(max_tile_rows, rows8)

    total_blocks = pl.cdiv(rows, tile_rows)              # real blocks in the slab
    num_cores = NUM_CORES if total_blocks >= NUM_CORES else 1
    steps = pl.cdiv(total_blocks, num_cores)             # reduction steps per core
    num_grid_blocks = num_cores * steps
    # Blocks >= this index need the row mask (partial last real block and/or phantom
    # blocks on the tail core); if none do, the masked branch is never emitted.
    first_masked_block = total_blocks if rows % tile_rows == 0 else total_blocks - 1

    kernel = functools.partial(
        _focal_loss_kernel,
        alpha=float(alpha),
        gamma=float(gamma),
        tile_rows=tile_rows,
        steps=steps,
        valid_rows=rows,
        first_masked_block=first_masked_block,
        num_grid_blocks=num_grid_blocks,
    )

    def in_index(c, j):
        # Clamp phantom tail-core blocks onto the last real block so the auto-DMA
        # never reads out of range; their contribution is masked to zero in-kernel.
        return (jnp.minimum(c * steps + j, total_blocks - 1), 0)

    partials = pl.pallas_call(
        kernel,
        out_shape=jax.ShapeDtypeStruct((num_cores * 8, LANES), jnp.float32),
        grid=(num_cores, steps),
        in_specs=[
            pl.BlockSpec((tile_rows, LANES), in_index),
            pl.BlockSpec((tile_rows, LANES), in_index),
        ],
        out_specs=pl.BlockSpec((8, LANES), lambda c, j: (c, 0)),
        scratch_shapes=[pltpu.VMEM((8, LANES), jnp.float32)],
        compiler_params=pltpu.CompilerParams(
            dimension_semantics=("parallel", "arbitrary"),
        ),
        cost_estimate=pl.CostEstimate(
            flops=18 * num_grid_blocks * tile_rows * LANES,
            transcendentals=3 * num_grid_blocks * tile_rows * LANES,
            bytes_accessed=rows * LANES * bytes_per_elem + num_cores * 8 * LANES * 4,
        ),
    )(x2, t2)

    # Tiny (<=16x128) cross-core + cross-lane reduce and the mean, done in the wrapper.
    return jnp.sum(partials) / jnp.float32(n)


def _reference_loss(inputs, targets, alpha=0.25, gamma=2.0):
    """Pure-JAX reference mirroring the PyTorch module."""
    x = inputs.astype(jnp.float32)
    t = targets.astype(jnp.float32)
    pos = (t > 0.5).astype(jnp.float32)
    neg = (t < 0.5).astype(jnp.float32)
    bce = jnp.maximum(x, 0.0) - x * t + jnp.log1p(jnp.exp(-jnp.abs(x)))
    pt = jnp.exp(-bce)
    fl = (1.0 - pt) ** gamma * bce
    fl = alpha * pos * fl + (1.0 - alpha) * neg * fl
    return jnp.mean(fl)


if __name__ == "__main__":
    key = jax.random.PRNGKey(0)
    k1, k2, k3, k4 = jax.random.split(key, 4)

    # Primary check: small, lane-aligned shape typical for this module.
    B, C, H, W = 2, 4, 16, 16
    logits = jax.random.normal(k1, (B, C, H, W), dtype=jnp.float32)
    targets = jax.random.bernoulli(k2, 0.5, (B, C, H, W)).astype(jnp.float32)
    loss = jax.block_until_ready(official_binary_focal_loss(logits, targets))
    ref = jax.block_until_ready(_reference_loss(logits, targets))
    assert loss.shape == () and jnp.isfinite(loss)
    assert jnp.allclose(loss, ref, rtol=1e-4, atol=1e-5), (loss, ref)

    # Non-128-aligned element count: exercises the sentinel tail pad + row mask.
    shp = (3, 5, 7, 11)
    lg2 = jax.random.normal(k3, shp, dtype=jnp.float32)
    tg2 = jax.random.bernoulli(k4, 0.3, shp).astype(jnp.float32)
    l2 = jax.block_until_ready(official_binary_focal_loss(lg2, tg2))
    r2 = jax.block_until_ready(_reference_loss(lg2, tg2))
    assert jnp.allclose(l2, r2, rtol=1e-4, atol=1e-5), (l2, r2)

    # Small-tile overrides: exercise the 2-core grid split, the per-core output
    # blocks / wrapper-side cross-core sum, and the partial-last-block mask path.
    l3 = jax.block_until_ready(
        official_binary_focal_loss(logits, targets, max_tile_rows=8))
    assert jnp.allclose(l3, ref, rtol=1e-4, atol=1e-5), (l3, ref)
    l4 = jax.block_until_ready(
        official_binary_focal_loss(lg2, tg2, max_tile_rows=8))
    assert jnp.allclose(l4, r2, rtol=1e-4, atol=1e-5), (l4, r2)

    print("KERNEL_OK")
</pallas_src>

<mosaic_0001>
module attributes {stable_mosaic.version = 11 : i64} {
  func.func @_focal_loss_kernel(%arg0: i32, %arg1: i32, %arg2: memref<16x128xf32, #tpu.memory_space<vmem>>, %arg3: memref<16x128xf32, #tpu.memory_space<vmem>>, %arg4: memref<8x128xf32, #tpu.memory_space<vmem>>, %arg5: memref<8x128xf32, #tpu.memory_space<vmem>>) attributes {dimension_semantics = [#tpu.dimension_semantics<parallel>, #tpu.dimension_semantics<arbitrary>], iteration_bounds = array<i64: 1, 1>, scalar_prefetch = 0 : i64, scratch_operands = 1 : i64, tpu.core_type = #tpu.core_type<tc>, window_params = [{transform_indices = @transform_0, window_bounds = array<i64: 16, 128>}, {transform_indices = @transform_1, window_bounds = array<i64: 16, 128>}, {transform_indices = @transform_2, window_bounds = array<i64: 8, 128>}]} {
    %c0_i32 = arith.constant 0 : i32
    %0 = arith.cmpi eq, %arg1, %c0_i32 : i32
    %1 = arith.extui %0 : i1 to i32
    %c0_i32_0 = arith.constant 0 : i32
    %2 = arith.cmpi ne, %1, %c0_i32_0 : i32
    scf.if %2 {
      %cst_21 = arith.constant 0.000000e+00 : f32
      %46 = vector.broadcast %cst_21 : f32 to vector<8x128xf32>
      %c0_22 = arith.constant 0 : index
      %c0_23 = arith.constant 0 : index
      %47 = vector.load %arg5[%c0_22, %c0_23] : memref<8x128xf32, #tpu.memory_space<vmem>>, vector<8x128xf32>
      tpu.vector_store %arg5[%c0_22, %c0_23], %46 {strides = array<i32>} : memref<8x128xf32, #tpu.memory_space<vmem>>, vector<8x128xf32>,
    } else {
    }
    %c0 = arith.constant 0 : index
    %c0_1 = arith.constant 0 : index
    %3 = vector.load %arg2[%c0, %c0_1] : memref<16x128xf32, #tpu.memory_space<vmem>>, vector<16x128xf32>
    %c0_2 = arith.constant 0 : index
    %c0_3 = arith.constant 0 : index
    %4 = vector.load %arg3[%c0_2, %c0_3] : memref<16x128xf32, #tpu.memory_space<vmem>>, vector<16x128xf32>
    %cst = arith.constant 5.000000e-01 : f32
    %5 = vector.broadcast %cst : f32 to vector<16x128xf32>
    %6 = arith.cmpf ogt, %4, %5 : vector<16x128xf32>
    %7 = math.absf %3 : vector<16x128xf32>
    %cst_4 = arith.constant 0.000000e+00 : f32
    %8 = vector.broadcast %cst_4 : f32 to vector<16x128xf32>
    %9 = arith.subf %8, %7 : vector<16x128xf32>
    %10 = math.exp %9 : vector<16x128xf32>
    %cst_5 = arith.constant 0.000000e+00 : f32
    %11 = vector.broadcast %cst_5 : f32 to vector<16x128xf32>
    %12 = arith.maximumf %3, %11 : vector<16x128xf32>
    %13 = arith.mulf %3, %4 : vector<16x128xf32>
    %14 = arith.subf %12, %13 : vector<16x128xf32>
    %15 = math.log1p %10 : vector<16x128xf32>
    %16 = arith.addf %14, %15 : vector<16x128xf32>
    %cst_6 = arith.constant 0.000000e+00 : f32
    %17 = vector.broadcast %cst_6 : f32 to vector<16x128xf32>
    %18 = arith.cmpf olt, %3, %17 : vector<16x128xf32>
    %19 = arith.xori %6, %18 : vector<16x128xi1>
    %cst_7 = arith.constant 1.000000e+00 : f32
    %20 = vector.broadcast %cst_7 : f32 to vector<16x128xf32>
    %21 = arith.select %19, %20, %10 : vector<16x128xi1>, vector<16x128xf32>
    %cst_8 = arith.constant 1.000000e+00 : f32
    %22 = vector.broadcast %cst_8 : f32 to vector<16x128xf32>
    %23 = arith.addf %22, %10 : vector<16x128xf32>
    %24 = tpu.reciprocal %23 : vector<16x128xf32> -> vector<16x128xf32>
    %25 = arith.mulf %21, %24 : vector<16x128xf32>
    %cst_9 = arith.constant 1.000000e+00 : f32
    %26 = vector.broadcast %cst_9 : f32 to vector<16x128xf32>
    %27 = arith.subf %26, %25 : vector<16x128xf32>
    %28 = arith.mulf %27, %27 : vector<16x128xf32>
    %cst_10 = arith.constant 5.000000e-01 : f32
    %29 = vector.broadcast %cst_10 : f32 to vector<16x128xf32>
    %30 = arith.cmpf olt, %4, %29 : vector<16x128xf32>
    %cst_11 = arith.constant 7.500000e-01 : f32
    %cst_12 = arith.constant 0.000000e+00 : f32
    %31 = vector.broadcast %cst_11 : f32 to vector<16x128xf32>
    %32 = vector.broadcast %cst_12 : f32 to vector<16x128xf32>
    %33 = arith.select %30, %31, %32 : vector<16x128xi1>, vector<16x128xf32>
    %cst_13 = arith.constant 2.500000e-01 : f32
    %34 = vector.broadcast %cst_13 : f32 to vector<16x128xf32>
    %35 = arith.select %6, %34, %33 : vector<16x128xi1>, vector<16x128xf32>
    %36 = arith.mulf %28, %16 : vector<16x128xf32>
    %37 = arith.mulf %35, %36 : vector<16x128xf32>
    %c0_14 = arith.constant 0 : index
    %c0_15 = arith.constant 0 : index
    %38 = vector.load %arg5[%c0_14, %c0_15] : memref<8x128xf32, #tpu.memory_space<vmem>>, vector<8x128xf32>
    %39 = vector.shape_cast %37 : vector<16x128xf32> to vector<2x8x128xf32>
    %cst_16 = arith.constant dense<0.000000e+00> : vector<8x128xf32>
    %40 = vector.multi_reduction <add>, %39, %cst_16 [0] : vector<2x8x128xf32> to vector<8x128xf32>
    %41 = arith.addf %38, %40 : vector<8x128xf32>
    %c0_17 = arith.constant 0 : index
    %c0_18 = arith.constant 0 : index
    %42 = vector.load %arg5[%c0_17, %c0_18] : memref<8x128xf32, #tpu.memory_space<vmem>>, vector<8x128xf32>
    tpu.vector_store %arg5[%c0_17, %c0_18], %41 {strides = array<i32>} : memref<8x128xf32, #tpu.memory_space<vmem>>, vector<8x128xf32>,
    %c0_i32_19 = arith.constant 0 : i32
    %43 = arith.cmpi eq, %arg1, %c0_i32_19 : i32
    %44 = arith.extui %43 : i1 to i32
    %c0_i32_20 = arith.constant 0 : i32
    %45 = arith.cmpi ne, %44, %c0_i32_20 : i32
    scf.if %45 {
      %c0_21 = arith.constant 0 : index
      %c0_22 = arith.constant 0 : index
      %46 = vector.load %arg5[%c0_21, %c0_22] : memref<8x128xf32, #tpu.memory_space<vmem>>, vector<8x128xf32>
      %c0_23 = arith.constant 0 : index
      %c0_24 = arith.constant 0 : index
      %47 = vector.load %arg4[%c0_23, %c0_24] : memref<8x128xf32, #tpu.memory_space<vmem>>, vector<8x128xf32>
      tpu.vector_store %arg4[%c0_23, %c0_24], %46 {strides = array<i32>} : memref<8x128xf32, #tpu.memory_space<vmem>>, vector<8x128xf32>,
    } else {
    }
    return
  }
  func.func @transform_0(%arg0: i32, %arg1: i32) -> (i32, i32) {
    %c1_i32 = arith.constant 1 : i32
    %0 = arith.muli %arg0, %c1_i32 : i32
    %1 = arith.addi %0, %arg1 : i32
    %c0_i32 = arith.constant 0 : i32
    %2 = arith.minsi %1, %c0_i32 : i32
    %c0_i32_0 = arith.constant 0 : i32
    %c0_i32_1 = arith.constant 0 : i32
    return %2, %c0_i32_0 : i32, i32
  }
  func.func @transform_1(%arg0: i32, %arg1: i32) -> (i32, i32) {
    %c1_i32 = arith.constant 1 : i32
    %0 = arith.muli %arg0, %c1_i32 : i32
    %1 = arith.addi %0, %arg1 : i32
    %c0_i32 = arith.constant 0 : i32
    %2 = arith.minsi %1, %c0_i32 : i32
    %c0_i32_0 = arith.constant 0 : i32
    %c0_i32_1 = arith.constant 0 : i32
    return %2, %c0_i32_0 : i32, i32
  }
  func.func @transform_2(%arg0: i32, %arg1: i32) -> (i32, i32) {
    %c0_i32 = arith.constant 0 : i32
    %c0_i32_0 = arith.constant 0 : i32
    return %arg0, %c0_i32 : i32, i32
  }
}

</mosaic_0001>

<bundles_post_ra>
// kernel: tpu_custom_call.1
= control target key start
LH: loop header
LB: loop body
LE: loop exit
PB: predicated region body
PF: predicated region fallthrough
CT: control target
= control target key end

     0   :  { %7 = vsyncpa [#allocation4], 0  ;;  %s335_s0 = inlined_call_operand.hbm [shape: f32[16,128], index: 0, kind: input, shape index: {}]   ;;  %s336_s1 = inlined_call_operand.hbm [shape: f32[16,128], index: 1, kind: input, shape index: {}]   ;;  %s337_s2 = inlined_call_operand.hbm [shape: f32[8,128], index: 2, kind: output, shape index: {}]  }
   0x1   :  { %8 = vsyncpa [#allocation7], 0 }
   0x2   :  { %9 = vsyncpa [#allocation5], 0  ;;  %s250_s9 = smov [#allocation3]   ;;  %s178_s13 = scalar_lea.hbm %s335_s0, 256 }
   0x3   :  { %s21_s10 = sshll.u32 %s250_s9, 4  ;;  %p179_p0 = scmp.ne.s32.totalorder %s335_s0, %s178_s13  ;;  %s22_s10 = int_to_ptr.vmem [resolvable:$true] %s21_s10 }
   0x4   :  { %p182_p1 = scmp.lt.u32.totalorder %s178_s13, %s335_s0 }
   0x6   :  { %p184_p2 = pnand %p182_p1, %p179_p0 }
   0x8   :  { %187 = shalt.err (!%p184_p2)
}
   0x9   :  { %s188_s18 = scalar_lea.vmem %s22_s10, 256  ;;  %p193_p4 = scmp.lt.s32.totalorder %s22_s10, %s22_s10 }
   0xa   :  { %p189_p3 = scmp.ne.s32.totalorder %s22_s10, %s188_s18  ;;  %p194_p5 = scmp.lt.s32.totalorder %s188_s18, %s188_s18 }
   0xc   :  { %p195_p6 = por %p194_p5, %p193_p4 }
   0xe   :  { %p196_p7 = pnand %p195_p6, %p189_p3 }
  0x10   :  { %199 = shalt.err (!%p196_p7)
}
  0x11   :  { %s251_s19 = smov 128   ;;  %s252_s20 = smov 8  }
  0x12   :  { %27 = dma.hbm_to_vmem [thread:$0]  %s335_s0, 256, %s22_s10, [#allocation4], %s251_s19, %s251_s19, %s252_s20  }
  0x13   :  { %s253_s23 = smov [#allocation6]   ;;  %s200_s27 = scalar_lea.hbm %s336_s1, 256 }
  0x14   :  { %s39_s24 = sshll.u32 %s253_s23, 4  ;;  %p201_p8 = scmp.ne.s32.totalorder %s336_s1, %s200_s27  ;;  %s40_s24 = int_to_ptr.vmem [resolvable:$true] %s39_s24 }
  0x15   :  { %p204_p9 = scmp.lt.u32.totalorder %s200_s27, %s336_s1 }
  0x17   :  { %p206_p10 = pnand %p204_p9, %p201_p8 }
  0x19   :  { %209 = shalt.err (!%p206_p10)
}
  0x1a   :  { %s210_s4 = scalar_lea.vmem %s40_s24, 256  ;;  %p215_p12 = scmp.lt.s32.totalorder %s40_s24, %s40_s24 }
  0x1b   :  { %p211_p11 = scmp.ne.s32.totalorder %s40_s24, %s210_s4  ;;  %p216_p13 = scmp.lt.s32.totalorder %s210_s4, %s210_s4 }
  0x1d   :  { %p217_p0 = por %p216_p13, %p215_p12 }
  0x1f   :  { %p218_p1 = pnand %p217_p0, %p211_p11 }
  0x21   :  { %221 = shalt.err (!%p218_p1)
}
  0x22   :  { %45 = dma.hbm_to_vmem [thread:$0]  %s336_s1, 256, %s40_s24, [#allocation7], %s251_s19, %s251_s19, %s252_s20  }
  0x23   :  { %244 = dma.done.wait [#allocation4], 256  }
  0x24   :  { %245 = vsyncadd [#allocation4], 4294967040 }
  0x25   :  { %246 = dma.done.wait [#allocation7], 256  }
  0x26   :  { %247 = vsyncadd [#allocation7], 4294967040  ;;  %v65_v0 = vld [vmem:[#allocation3] sm:$0xff]  ;;  %v66_v1 = vld [vmem:[#allocation3 + $0x8] sm:$0xff]  ;;  %v254_v46 = vmov 0.0   ;;  %s255_s1 = smov [#allocation8]  }
  0x27   :  { %v71_v2 = vand.u32 2147483647, %v65_v0  ;;  %v72_v3 = vand.u32 2147483647, %v66_v1  ;;  %v67_v12 = vld [vmem:[#allocation6] sm:$0xff]  ;;  %v68_v14 = vld [vmem:[#allocation6 + $0x8] sm:$0xff] }
  0x28   :  { %vm69_vm0 = vcmp.gt.f32.partialorder %v67_v12, 0.5  ;;  %vm105_vm1 = vcmp.lt.f32.partialorder %v65_v0, 0.0  ;;  %vm70_vm2 = vcmp.gt.f32.partialorder %v68_v14, 0.5  ;;  %vm106_vm3 = vcmp.lt.f32.partialorder %v66_v1, 0.0  ;;  %s146_s6 = sshll.u32 %s255_s1, 4  ;;  %s147_s6 = int_to_ptr.vmem [resolvable:$true] %s146_s6 }
  0x29   :  { %v73_v4 = vsub.f32 0.0, %v71_v2  ;;  %v74_v5 = vsub.f32 0.0, %v72_v3  ;;  %v79_v19 = vmax.f32 %v65_v0, 0.0  ;;  %v81_v20 = vmul.f32 %v67_v12, %v65_v0  ;;  %vm296_vm4 = vmxor %vm69_vm0, %vm105_vm1  ;;  %s222_s7 = scalar_lea.vmem %s147_s6, 128  ;;  %p227_p3 = scmp.lt.s32.totalorder %s147_s6, %s147_s6 }
  0x2a   :  { %v80_v23 = vmax.f32 %v66_v1, 0.0  ;;  %v82_v24 = vmul.f32 %v68_v14, %v66_v1  ;;  %vm301_vm5 = vmxor %vm70_vm2, %vm106_vm3  ;;  %vm121_vm8 = vcmp.lt.f32.partialorder %v67_v12, 0.5  ;;  %vm122_vm9 = vcmp.lt.f32.partialorder %v68_v14, 0.5  ;;  %p223_p2 = scmp.ne.s32.totalorder %s147_s6, %s222_s7  ;;  %p228_p4 = scmp.lt.s32.totalorder %s222_s7, %s222_s7 }
  0x2b   :  { %v75_v6 = vmul.f32 1.442695, %v73_v4  ;;  %v77_v7 = vmul.f32 1.442695, %v74_v5  ;;  %v83_v32 = vsub.f32 %v79_v19, %v81_v20  ;;  %v123_v47 = vsel %vm121_vm8, 0.75, %v254_v46 }
  0x2c   :  { %v84_v37 = vsub.f32 %v80_v23, %v82_v24  ;;  %v124_v50 = vsel %vm122_vm9, 0.75, %v254_v46  ;;  %v125_v53 = vsel %vm69_vm0, 0.25, %v123_v47  ;;  %p229_p5 = por %p228_p4, %p227_p3 }
  0x2d   :  { %166 = vpow2.f32 %v75_v6  ;;  %v126_v54 = vsel %vm70_vm2, 0.25, %v124_v50 }
  0x2e   :  { %168 = vpow2.f32 %v77_v7  ;;  %p230_p6 = pnand %p229_p5, %p223_p2 }
  0x37   :  { %v167_v8 = vpop.eup %166 }
  0x38   :  { %v169_v9 = vpop.eup %168  ;;  %v85_v10 = vadd.f32 1.0, %v167_v8  ;;  %v88_v13 = vmul.f32 -0.5, %v167_v8  ;;  %v91_v17 = vand.u32 2147483647, %v167_v8  ;;  %v109_v30 = vsel %vm296_vm4, 1.0, %v167_v8 }
  0x39   :  { %v94_v11 = vadd.f32 1.0, %v169_v9  ;;  %v97_v15 = vmul.f32 -0.5, %v169_v9  ;;  %v100_v21 = vand.u32 2147483647, %v169_v9  ;;  %v110_v35 = vsel %vm301_vm5, 1.0, %v169_v9 }
  0x3a   :  { %170 = vlog2.f32 %v85_v10  ;;  %v89_v16 = vadd.f32 1.0, %v88_v13  ;;  %vm305_vm6 = vcmp.lt.f32.partialorder %v91_v17, 0.0004427343 }
  0x3b   :  { %172 = vlog2.f32 %v94_v11  ;;  %v98_v18 = vadd.f32 1.0, %v97_v15  ;;  %vm311_vm7 = vcmp.lt.f32.partialorder %v100_v21, 0.0004427343 }
  0x3c   :  { %174 = vrcp.f32 %v85_v10  ;;  %v90_v26 = vmul.f32 %v167_v8, %v89_v16 }
  0x3d   :  { %176 = vrcp.f32 %v94_v11  ;;  %v99_v29 = vmul.f32 %v169_v9, %v98_v18 }
  0x44   :  { %v171_v27 = vpop.eup %170 }
  0x45   :  { %v173_v31 = vpop.eup %172  ;;  %v87_v33 = vmul.f32 0.6931472, %v171_v27 }
  0x46   :  { %v175_v36 = vpop.eup %174  ;;  %v96_v38 = vmul.f32 0.6931472, %v173_v31 }
  0x47   :  { %v177_v39 = vpop.eup %176  ;;  %v93_v40 = vsel %vm305_vm6, %v90_v26, %v87_v33  ;;  %v115_v41 = vmul.f32 %v175_v36, %v109_v30 }
  0x48   :  { %v102_v42 = vsel %vm311_vm7, %v99_v29, %v96_v38  ;;  %v116_v43 = vmul.f32 %v177_v39, %v110_v35  ;;  %v103_v44 = vadd.f32 %v93_v40, %v83_v32 }
  0x49   :  { %v117_v45 = vsub.f32 1.0, %v115_v41  ;;  %v104_v48 = vadd.f32 %v102_v42, %v84_v37 }
  0x4a   :  { %v118_v49 = vsub.f32 1.0, %v116_v43 }
  0x4b   :  { %v119_v51 = vmul.f32 %v117_v45, %v117_v45 }
  0x4c   :  { %v120_v52 = vmul.f32 %v118_v49, %v118_v49 }
  0x4d   :  { %v127_v55 = vmul.f32 %v119_v51, %v103_v44 }
  0x4e   :  { %v128_v56 = vmul.f32 %v120_v52, %v104_v48 }
  0x4f   :  { %v129_v57 = vmul.f32 %v127_v55, %v125_v53 }
  0x50   :  { %v130_v58 = vmul.f32 %v128_v56, %v126_v54 }
  0x52   :  { %v132_v59 = vadd.f32 %v130_v58, %v129_v57 }
  0x54   :  { %139 = vst [vmem:[#allocation8] sm:$0xff] %v132_v59 }
  0x55   :  { %233 = shalt.err (!%p230_p6)
}
  0x56   :  { %s234_s10 = scalar_lea.hbm %s337_s2, 128 }
  0x57   :  { %p235_p7 = scmp.ne.s32.totalorder %s337_s2, %s234_s10  ;;  %p238_p8 = scmp.lt.u32.totalorder %s234_s10, %s337_s2 }
  0x59   :  { %p240_p9 = pnand %p238_p8, %p235_p7 }
  0x5b   :  { %243 = shalt.err (!%p240_p9)
}
  0x5c   :  { %149 = dma.vmem_to_hbm [thread:$0]  %s147_s6, 128, %s337_s2, [#allocation5]  }
  0x5d   :  { %248 = dma.done.wait [#allocation5], 128  }
  0x5e   :  { %249 = vsyncadd [#allocation5], 4294967168 }
  0x5f   :  { %153 = vsyncpa [#allocation4], 1 }
  0x60   :  { %154 = vsyncpa [#allocation7], 1 }
  0x61   :  { %155 = vsyncpa [#allocation5], 1 }

</bundles_post_ra>
